<compile_context>
chip_gen: v5e
topology: v5e:2x2
jax: 0.10.0
libtpu: 0.0.40
codegen_flags: <defaults>
</compile_context>

<pallas_src>
import functools

import jax
import jax.numpy as jnp
from jax.experimental import pallas as pl
from jax.experimental.pallas import tpu as pltpu


# ----------------------------- config (small) ---------------------------------
B = 2                  # batch
S = 16                 # sequence length
H = 32                 # hidden size (real DeBERTa uses 768; small stand-in)
VOCAB = 100
FILTER_SIZES = (2, 3, 4, 5)
FS_MAX = max(FILTER_SIZES)
NUM_FILTERS = 128
NUM_LABELS = 6
NF_TOTAL = len(FILTER_SIZES) * NUM_FILTERS   # 512 -> 4 full 128-lane tiles


# ------------------------------ Pallas kernel ---------------------------------
def _cnn_head_kernel(x_ref, w_taps_ref, b_all_ref, thr_ref, out_ref, *,
                     batch, seq_len, fs_max, nf_total):
    """Whole batch in one program: conv (all filter sizes) + bias + ReLU + masked max-pool.

    x_ref      : (B*S, H)            f32   activations, batch folded into matmul M
    w_taps_ref : (fs_max, H, 4F)     bf16  per-tap packed conv weights (taps k>=fs zeroed)
    b_all_ref  : (1, 4F)             f32   concatenated conv biases
    thr_ref    : (1, 4F)             int32 per-lane valid-window threshold (S - fs)
    out_ref    : (B, 4F)             f32   pooled features (lane-dense: 4 x 128 lanes)
    """
    m_rows = batch * seq_len
    x = x_ref[...]                                              # (M, H) f32

    # Conv over all filter sizes as fs_max accumulated MXU matmuls:
    #   acc[r, :] += x[(r + k) % M, :] @ W_tap[k]     (K = H per tap, f32 accumulation)
    # Shifted copies come from pltpu.roll (XLU sublane rotate -- no slice/concat copies
    # on the load/store slots).  Wrapped rows only land at masked window positions.
    acc = jnp.dot(x.astype(jnp.bfloat16), w_taps_ref[0],
                  preferred_element_type=jnp.float32)           # (M, 4F) f32
    for k in range(1, fs_max):
        xs = pltpu.roll(x, shift=m_rows - k, axis=0)            # row r -> x[(r + k) % M]
        acc = acc + jnp.dot(xs.astype(jnp.bfloat16), w_taps_ref[k],
                            preferred_element_type=jnp.float32)

    # Epilogue in f32 (v5e VPU has no bf16): conv bias + ReLU.
    y = jnp.maximum(acc + b_all_ref[...], 0.0)                  # (M, 4F)

    # Fused masked max-pool over time for all four filter-size groups at once.
    # Valid window positions for group g are t <= S - fs_g (per-lane threshold); invalid
    # (and wrap-contaminated) positions are zeroed, which is exact post-ReLU.
    y3 = y.reshape(batch, seq_len, nf_total)                    # (B, S, 4F)
    t_idx = jax.lax.broadcasted_iota(jnp.int32, (batch, seq_len, nf_total), 1)
    thr = thr_ref[...].reshape(1, 1, nf_total)
    y3 = jnp.where(t_idx <= thr, y3, 0.0)
    out_ref[...] = jnp.max(y3, axis=1)                          # (B, 4F) lane-dense f32


# ------------------------------ weight packing ---------------------------------
def _pack_conv_params(conv_params, seq_len):
    """Pack per-filter-size conv weights (fs, H, F) into a per-tap matrix stack
    (fs_max, H, 4F) with taps k >= fs zero-padded, concatenated biases (1, 4F),
    and the per-lane valid-window thresholds (1, 4F) int32."""
    w_taps = jnp.zeros((FS_MAX, H, NF_TOTAL), jnp.float32)
    biases, thrs = [], []
    for g, ((w, b), fs) in enumerate(zip(conv_params, FILTER_SIZES)):
        w_taps = w_taps.at[:fs, :, g * NUM_FILTERS:(g + 1) * NUM_FILTERS].set(w)
        biases.append(b)
        thrs.append(jnp.full((1, NUM_FILTERS), seq_len - fs, jnp.int32))
    return (w_taps.astype(jnp.bfloat16),                       # (fs_max, H, 4F) bf16
            jnp.concatenate(biases, axis=-1).astype(jnp.float32),   # (1, 4F) f32
            jnp.concatenate(thrs, axis=-1))                         # (1, 4F) int32


# ------------------------------ wrapper -----------------------------------------
def deberta_cnn_classifier(sequence_output, conv_params, wc, bc):
    """sequence_output: (B, S, H) f32.  conv_params: list of (W(fs,H,F), b(1,F)).
    wc: (4F, num_labels) f32, bc: (1, num_labels) f32.  Returns (B, num_labels)."""
    bsz, seq_len, hidden = sequence_output.shape
    # Every filter size needs at least one valid window position.
    assert seq_len >= FS_MAX, f"seq_len={seq_len} must be >= max filter size {FS_MAX}"

    w_taps, b_all, thr = _pack_conv_params(conv_params, seq_len)
    x2 = sequence_output.reshape(bsz * seq_len, hidden).astype(jnp.float32)

    kernel = functools.partial(
        _cnn_head_kernel,
        batch=bsz, seq_len=seq_len, fs_max=FS_MAX, nf_total=NF_TOTAL)

    flops = int(2 * (bsz * seq_len) * hidden * NF_TOTAL * FS_MAX)
    bytes_accessed = int(x2.size * 4 + w_taps.size * 2 + b_all.size * 4
                         + thr.size * 4 + bsz * NF_TOTAL * 4)

    feats = pl.pallas_call(
        kernel,
        out_shape=jax.ShapeDtypeStruct((bsz, NF_TOTAL), jnp.float32),
        # Single program (no grid): whole arrays resident in VMEM (< 1 MiB total).
        in_specs=[
            pl.BlockSpec(memory_space=pltpu.MemorySpace.VMEM),   # x (B*S, H)
            pl.BlockSpec(memory_space=pltpu.MemorySpace.VMEM),   # packed per-tap conv W
            pl.BlockSpec(memory_space=pltpu.MemorySpace.VMEM),   # conv bias
            pl.BlockSpec(memory_space=pltpu.MemorySpace.VMEM),   # pooling thresholds
        ],
        out_specs=pl.BlockSpec(memory_space=pltpu.MemorySpace.VMEM),
        compiler_params=pltpu.CompilerParams(
            vmem_limit_bytes=4 * 1024 * 1024),                   # actual need << 1 MiB
        cost_estimate=pl.CostEstimate(
            flops=flops, transcendentals=0, bytes_accessed=bytes_accessed),
    )(x2, w_taps, b_all, thr)

    # Dropout(0.1) is identity in eval mode.  Classifier stays in f32 in the wrapper:
    # the kernel output is the lane-dense 512-wide feature slab, and the 512x6 GEMV is
    # negligible, so XLA handles it without a masked 6-lane kernel store.
    return feats @ wc + bc                                       # (B, num_labels)


# --------------------------- plain-JAX reference --------------------------------
def reference(sequence_output, conv_params, wc, bc):
    x = sequence_output.astype(jnp.float32)
    pooled = []
    for fs, (w, b) in zip(FILTER_SIZES, conv_params):
        L = x.shape[1] - fs + 1
        acc = jnp.zeros((x.shape[0], L, NUM_FILTERS), jnp.float32)
        for k in range(fs):
            acc = acc + jnp.einsum("bld,df->blf", x[:, k:k + L, :], w[k])
        acc = jnp.maximum(acc + b[None, :, :], 0.0)
        pooled.append(jnp.max(acc, axis=1))
    feats = jnp.concatenate(pooled, axis=-1)
    return feats @ wc + bc


# ------------------------------ main ---------------------------------------------
if __name__ == "__main__":
    key = jax.random.PRNGKey(0)
    k_ids, k_emb, k_w, k_b, k_wc, k_bc = jax.random.split(key, 6)

    # Synthetic "DeBERTa" stand-in: deterministic embedding lookup (glue, not hot path).
    input_ids = jax.random.randint(k_ids, (B, S), 0, VOCAB, dtype=jnp.int32)
    attention_mask = jnp.ones((B, S), dtype=jnp.int32)  # accepted, unused by the stub
    emb_table = jax.random.normal(k_emb, (VOCAB, H), jnp.float32) * 0.1
    sequence_output = emb_table[input_ids]               # (B, S, H)

    # Conv2d(1, F, (fs, H)) weights: torch shape (F, 1, fs, H) -> here (fs, H, F).
    conv_params = []
    wkeys = jax.random.split(k_w, len(FILTER_SIZES))
    bkeys = jax.random.split(k_b, len(FILTER_SIZES))
    for i, fs in enumerate(FILTER_SIZES):
        w = jax.random.normal(wkeys[i], (fs, H, NUM_FILTERS), jnp.float32) * 0.05
        b = jax.random.normal(bkeys[i], (1, NUM_FILTERS), jnp.float32) * 0.01
        conv_params.append((w, b))

    # Linear(len(fs)*F, num_labels): torch weight (num_labels, 4F) -> here (4F, num_labels).
    wc = jax.random.normal(k_wc, (NF_TOTAL, NUM_LABELS), jnp.float32) * 0.02
    bc = jax.random.normal(k_bc, (1, NUM_LABELS), jnp.float32) * 0.01

    out = deberta_cnn_classifier(sequence_output, conv_params, wc, bc)
    out = jax.block_until_ready(out)

    ref = reference(sequence_output, conv_params, wc, bc)
    assert out.shape == (B, NUM_LABELS)
    # Conv matmul operands are bf16 (f32 accumulation); classifier is pure f32 now.
    # Observed error is ~1e-3 at these magnitudes.
    assert jnp.allclose(out, ref, atol=1e-2, rtol=1e-2), "mismatch vs reference"

    print("KERNEL_OK")
</pallas_src>

<mosaic_0001>
module attributes {stable_mosaic.version = 11 : i64} {
  func.func @_cnn_head_kernel(%arg0: memref<32x32xf32, #tpu.memory_space<vmem>>, %arg1: memref<5x32x512xbf16, #tpu.memory_space<vmem>>, %arg2: memref<1x512xf32, #tpu.memory_space<vmem>>, %arg3: memref<1x512xi32, #tpu.memory_space<vmem>>, %arg4: memref<2x512xf32, #tpu.memory_space<vmem>>) attributes {dimension_semantics = [], scalar_prefetch = 0 : i64, scratch_operands = 0 : i64, tpu.core_type = #tpu.core_type<tc>} {
    %c0 = arith.constant 0 : index
    %c0_0 = arith.constant 0 : index
    %0 = vector.load %arg0[%c0, %c0_0] : memref<32x32xf32, #tpu.memory_space<vmem>>, vector<32x32xf32>
    %1 = arith.truncf %0 : vector<32x32xf32> to vector<32x32xbf16>
    %c0_1 = arith.constant 0 : index
    %c0_2 = arith.constant 0 : index
    %c0_3 = arith.constant 0 : index
    %2 = vector.load %arg1[%c0_1, %c0_2, %c0_3] : memref<5x32x512xbf16, #tpu.memory_space<vmem>>, vector<1x32x512xbf16>
    %3 = vector.shape_cast %2 : vector<1x32x512xbf16> to vector<32x512xbf16>
    %cst = arith.constant dense<0.000000e+00> : vector<32x512xf32>
    %4 = tpu.matmul %1, %3, %cst {dimension_numbers = #tpu.dot_dimension_numbers<[1], [0], [0], [1], [0, 0, 1, 1], [], []>} : vector<32x32xbf16>, vector<32x512xbf16>, vector<32x512xf32> -> vector<32x512xf32>
    %c31_i32 = arith.constant 31 : i32
    %5 = tpu.dynamic_rotate %0 by %c31_i32 dim 0 : vector<32x32xf32>, i32 -> vector<32x32xf32>
    %6 = arith.truncf %5 : vector<32x32xf32> to vector<32x32xbf16>
    %c1 = arith.constant 1 : index
    %c0_4 = arith.constant 0 : index
    %c0_5 = arith.constant 0 : index
    %7 = vector.load %arg1[%c1, %c0_4, %c0_5] : memref<5x32x512xbf16, #tpu.memory_space<vmem>>, vector<1x32x512xbf16>
    %8 = vector.shape_cast %7 : vector<1x32x512xbf16> to vector<32x512xbf16>
    %cst_6 = arith.constant dense<0.000000e+00> : vector<32x512xf32>
    %9 = tpu.matmul %6, %8, %cst_6 {dimension_numbers = #tpu.dot_dimension_numbers<[1], [0], [0], [1], [0, 0, 1, 1], [], []>} : vector<32x32xbf16>, vector<32x512xbf16>, vector<32x512xf32> -> vector<32x512xf32>
    %10 = arith.addf %4, %9 : vector<32x512xf32>
    %c30_i32 = arith.constant 30 : i32
    %11 = tpu.dynamic_rotate %0 by %c30_i32 dim 0 : vector<32x32xf32>, i32 -> vector<32x32xf32>
    %12 = arith.truncf %11 : vector<32x32xf32> to vector<32x32xbf16>
    %c2 = arith.constant 2 : index
    %c0_7 = arith.constant 0 : index
    %c0_8 = arith.constant 0 : index
    %13 = vector.load %arg1[%c2, %c0_7, %c0_8] : memref<5x32x512xbf16, #tpu.memory_space<vmem>>, vector<1x32x512xbf16>
    %14 = vector.shape_cast %13 : vector<1x32x512xbf16> to vector<32x512xbf16>
    %cst_9 = arith.constant dense<0.000000e+00> : vector<32x512xf32>
    %15 = tpu.matmul %12, %14, %cst_9 {dimension_numbers = #tpu.dot_dimension_numbers<[1], [0], [0], [1], [0, 0, 1, 1], [], []>} : vector<32x32xbf16>, vector<32x512xbf16>, vector<32x512xf32> -> vector<32x512xf32>
    %16 = arith.addf %10, %15 : vector<32x512xf32>
    %c29_i32 = arith.constant 29 : i32
    %17 = tpu.dynamic_rotate %0 by %c29_i32 dim 0 : vector<32x32xf32>, i32 -> vector<32x32xf32>
    %18 = arith.truncf %17 : vector<32x32xf32> to vector<32x32xbf16>
    %c3 = arith.constant 3 : index
    %c0_10 = arith.constant 0 : index
    %c0_11 = arith.constant 0 : index
    %19 = vector.load %arg1[%c3, %c0_10, %c0_11] : memref<5x32x512xbf16, #tpu.memory_space<vmem>>, vector<1x32x512xbf16>
    %20 = vector.shape_cast %19 : vector<1x32x512xbf16> to vector<32x512xbf16>
    %cst_12 = arith.constant dense<0.000000e+00> : vector<32x512xf32>
    %21 = tpu.matmul %18, %20, %cst_12 {dimension_numbers = #tpu.dot_dimension_numbers<[1], [0], [0], [1], [0, 0, 1, 1], [], []>} : vector<32x32xbf16>, vector<32x512xbf16>, vector<32x512xf32> -> vector<32x512xf32>
    %22 = arith.addf %16, %21 : vector<32x512xf32>
    %c28_i32 = arith.constant 28 : i32
    %23 = tpu.dynamic_rotate %0 by %c28_i32 dim 0 : vector<32x32xf32>, i32 -> vector<32x32xf32>
    %24 = arith.truncf %23 : vector<32x32xf32> to vector<32x32xbf16>
    %c4 = arith.constant 4 : index
    %c0_13 = arith.constant 0 : index
    %c0_14 = arith.constant 0 : index
    %25 = vector.load %arg1[%c4, %c0_13, %c0_14] : memref<5x32x512xbf16, #tpu.memory_space<vmem>>, vector<1x32x512xbf16>
    %26 = vector.shape_cast %25 : vector<1x32x512xbf16> to vector<32x512xbf16>
    %cst_15 = arith.constant dense<0.000000e+00> : vector<32x512xf32>
    %27 = tpu.matmul %24, %26, %cst_15 {dimension_numbers = #tpu.dot_dimension_numbers<[1], [0], [0], [1], [0, 0, 1, 1], [], []>} : vector<32x32xbf16>, vector<32x512xbf16>, vector<32x512xf32> -> vector<32x512xf32>
    %28 = arith.addf %22, %27 : vector<32x512xf32>
    %c0_16 = arith.constant 0 : index
    %c0_17 = arith.constant 0 : index
    %29 = vector.load %arg2[%c0_16, %c0_17] : memref<1x512xf32, #tpu.memory_space<vmem>>, vector<1x512xf32>
    %30 = vector.broadcast %29 : vector<1x512xf32> to vector<32x512xf32>
    %31 = arith.addf %28, %30 : vector<32x512xf32>
    %cst_18 = arith.constant 0.000000e+00 : f32
    %32 = vector.broadcast %cst_18 : f32 to vector<32x512xf32>
    %33 = arith.maximumf %31, %32 : vector<32x512xf32>
    %34 = vector.shape_cast %33 : vector<32x512xf32> to vector<2x16x512xf32>
    %35 = tpu.iota {dimensions = array<i32: 1>} : vector<2x16x512xi32>
    %c0_19 = arith.constant 0 : index
    %c0_20 = arith.constant 0 : index
    %36 = vector.load %arg3[%c0_19, %c0_20] : memref<1x512xi32, #tpu.memory_space<vmem>>, vector<1x512xi32>
    %37 = vector.shape_cast %36 : vector<1x512xi32> to vector<1x1x512xi32>
    %38 = vector.broadcast %37 : vector<1x1x512xi32> to vector<2x16x512xi32>
    %39 = arith.cmpi sle, %35, %38 : vector<2x16x512xi32>
    %cst_21 = arith.constant 0.000000e+00 : f32
    %40 = vector.broadcast %cst_21 : f32 to vector<2x16x512xf32>
    %41 = arith.select %39, %34, %40 : vector<2x16x512xi1>, vector<2x16x512xf32>
    %cst_22 = arith.constant dense<0xFF800000> : vector<2x512xf32>
    %42 = vector.multi_reduction <maximumf>, %41, %cst_22 [1] : vector<2x16x512xf32> to vector<2x512xf32>
    %c0_23 = arith.constant 0 : index
    %c0_24 = arith.constant 0 : index
    %43 = vector.load %arg4[%c0_23, %c0_24] : memref<2x512xf32, #tpu.memory_space<vmem>>, vector<2x512xf32>
    tpu.vector_store %arg4[%c0_23, %c0_24], %42 {strides = array<i32>} : memref<2x512xf32, #tpu.memory_space<vmem>>, vector<2x512xf32>,
    return
  }
}

</mosaic_0001>

<bundles_post_ra>
// kernel: tpu_custom_call.1
= control target key start
LH: loop header
LB: loop body
LE: loop exit
PB: predicated region body
PF: predicated region fallthrough
CT: control target
= control target key end

     0   :  { %9 = vsyncpa [#allocation3], 0  ;;  %s1693_s0 = inlined_call_operand.hbm [shape: f32[32,32], index: 0, kind: input, shape index: {}]   ;;  %s1694_s1 = inlined_call_operand.hbm [shape: bf16[5,32,512], index: 1, kind: input, shape index: {}]   ;;  %s1695_s2 = inlined_call_operand.hbm [shape: f32[1,512], index: 2, kind: input, shape index: {}]   ;;  %s1696_s3 = inlined_call_operand.hbm [shape: s32[1,512], index: 3, kind: input, shape index: {}]   ;;  %s1697_s4 = inlined_call_operand.hbm [shape: f32[2,512], index: 4, kind: output, shape index: {}]  }
   0x1   :  { %10 = vsyncpa [#allocation6], 0 }
   0x2   :  { %11 = vsyncpa [#allocation9], 0  ;;  %s30_s17 = sshll.u32 %s1694_s1, 4  ;;  %s31_s17 = int_to_ptr.hbm [resolvable:$true] %s30_s17 }
   0x3   :  { %12 = vsyncpa [#allocation4], 0  ;;  %s1395_s18 = smov [#allocation5]   ;;  %s17_s22 = sshll.u32 %s1693_s0, 4  ;;  %s18_s22 = int_to_ptr.hbm [resolvable:$true] %s17_s22 }
   0x4   :  { %s32_s19 = sshll.u32 %s1395_s18, 4  ;;  %s1396_s23 = smov 256   ;;  %s33_s19 = int_to_ptr.vmem [resolvable:$true] %s32_s19 }
   0x5   :  { %s1397_s24 = smov 16   ;;  %s1398_s25 = smov [#allocation2]  }
   0x6   :  { %38 = dma.hbm_to_vmem [thread:$0]  %s31_s17, 5120, %s33_s19, [#allocation6], %s1396_s23, %s1396_s23, %s1397_s24  }
   0x7   :  { %s19_s26 = sshll.u32 %s1398_s25, 4  ;;  %s1399_s27 = smov 128   ;;  %s20_s26 = int_to_ptr.vmem [resolvable:$true] %s19_s26 }
   0x8   :  { %s1400_s28 = smov 8   ;;  %s44_s30 = sshll.u32 %s1695_s2, 4  ;;  %s45_s30 = int_to_ptr.hbm [resolvable:$true] %s44_s30 }
   0x9   :  { %25 = dma.hbm_to_vmem [thread:$0]  %s18_s22, 512, %s20_s26, [#allocation3], %s1399_s27, %s1399_s27, %s1400_s28  }
   0xa   :  { %s1401_s5 = smov [#allocation7]   ;;  %s55_s8 = sshll.u32 %s1696_s3, 4  ;;  %s56_s8 = int_to_ptr.hbm [resolvable:$true] %s55_s8 }
   0xb   :  { %s46_s6 = sshll.u32 %s1401_s5, 4  ;;  %s1402_s9 = smov [#allocation8]   ;;  %s47_s6 = int_to_ptr.vmem [resolvable:$true] %s46_s6 }
   0xc   :  { %49 = dma.hbm_to_vmem [thread:$0]  %s45_s30, 64, %s47_s6, [#allocation6]  }
   0xd   :  { %s57_s10 = sshll.u32 %s1402_s9, 4  ;;  %s58_s10 = int_to_ptr.vmem [resolvable:$true] %s57_s10 }
   0xe   :  { %60 = dma.hbm_to_vmem [thread:$0]  %s56_s8, 64, %s58_s10, [#allocation9]  }
   0xf   :  { %1387 = dma.done.wait [#allocation3], 512  }
  0x10   :  { %1388 = vsyncadd [#allocation3], 4294966784 }
  0x11   :  { %1389 = dma.done.wait [#allocation6], 5184  }
  0x12   :  { %1390 = vsyncadd [#allocation6], 4294962112 }
  0x13   :  { %1391 = dma.done.wait [#allocation9], 64  }
  0x14   :  { %1392 = vsyncadd [#allocation9], 4294967232  ;;  %v96_v0 = vlaneseq  ;;  %v1036_v2 = vld [vmem:[#allocation5 + $0x60] sm:$0xf]  ;;  %v1232_v3 = vld [vmem:[#allocation5 + $0x6c] sm:$0xf0] }
  0x15   :  { %v1230_v4 = vld [vmem:[#allocation5 + $0x64] sm:$0xf]  ;;  %v1037_v5 = vor.u32 %v1232_v3, %v1036_v2  ;;  %v1038_v6 = vld [vmem:[#allocation5 + $0x70] sm:$0xf0]  ;;  %v1044_v7 = vld [vmem:[#allocation5 + $0x68] sm:$0xf] }
  0x16   :  { %v1441_v1 = vshrl.u32 %v96_v0, 7  ;;  %v1233_v8 = vld [vmem:[#allocation5 + $0x74] sm:$0xf0]  ;;  %v1041_v9 = vor.u32 %v1230_v4, %v1038_v6  ;;  %v1231_v11 = vld [vmem:[#allocation5 + $0x6c] sm:$0xf]  ;;  %v1443_v25 = vld [vmem:[#allocation2] sm:$0xff] }
  0x17   :  { %v1045_v10 = vor.u32 %v1233_v8, %v1044_v7  ;;  %v1046_v12 = vld [vmem:[#allocation5 + $0x78] sm:$0xf0]  ;;  %v1020_v13 = vld [vmem:[#allocation5 + $0x40] sm:$0xf]  ;;  %167 = vmatpush.bf16.msra.mxu0 %v1037_v5  ;;  %v1228_v15 = vld [vmem:[#allocation5 + $0x4c] sm:$0xf0] }
  0x18   :  { %v1049_v14 = vor.u32 %v1231_v11, %v1046_v12  ;;  %v1226_v16 = vld [vmem:[#allocation5 + $0x44] sm:$0xf]  ;;  %v1022_v17 = vld [vmem:[#allocation5 + $0x50] sm:$0xf0]  ;;  %186 = vmatpush.bf16.msra.mxu1 %v1041_v9  ;;  %v1021_v18 = vor.u32 %v1228_v15, %v1020_v13  ;;  %v1028_v20 = vld [vmem:[#allocation5 + $0x48] sm:$0xf] }
  0x19   :  { %205 = vmatpush.bf16.msra.mxu2 %v1045_v10  ;;  %v1025_v19 = vor.u32 %v1226_v16, %v1022_v17  ;;  %v1229_v21 = vld [vmem:[#allocation5 + $0x54] sm:$0xf0]  ;;  %v1227_v22 = vld [vmem:[#allocation5 + $0x4c] sm:$0xf]  ;;  %v1030_v24 = vld [vmem:[#allocation5 + $0x58] sm:$0xf0] }
  0x1a   :  { %224 = vmatpush.bf16.msra.mxu3 %v1049_v14  ;;  %v1029_v23 = vor.u32 %v1229_v21, %v1028_v20  ;;  %v1445_v26 = vld [vmem:[#allocation2 + $0x8] sm:$0xff]  ;;  %vm98_vm0 = vcmp.lt.s32.totalorder %v1441_v1, 7  ;;  %v1033_v27 = vor.u32 %v1227_v22, %v1030_v24  ;;  %v1448_v28 = vld [vmem:[#allocation2 + $0x10] sm:$0xff]  ;;  %v92_v29 = vrot.slane %v1443_v25, 1  ;;  %v1225_v33 = vld [vmem:[#allocation5 + $0x34] sm:$0xf0] }
  0x1b   :  { %v93_v30 = vrot.slane %v1445_v26, 1  ;;  %v1084_v31 = vld [vmem:[#allocation5 + $0x28] sm:$0xf]  ;;  %168 = vmatpush.bf16.msra.mxu0 %v1021_v18  ;;  %v94_v32 = vrot.slane %v1448_v28, 1  ;;  %vm154_vm1 = vcmask 261120   ;;  %v1461_v56 = vld [vmem:[#allocation2 + $0x18] sm:$0xff] }
  0x1c   :  { %v1223_v34 = vld [vmem:[#allocation5 + $0x2c] sm:$0xf]  ;;  %187 = vmatpush.bf16.msra.mxu1 %v1025_v19  ;;  %v1085_v36 = vor.u32 %v1225_v33, %v1084_v31  ;;  %v1086_v37 = vld [vmem:[#allocation5 + $0x38] sm:$0xf0]  ;;  %v1222_v38 = vld [vmem:[#allocation5 + $0x24] sm:$0xf] }
  0x1d   :  { %206 = vmatpush.bf16.msra.mxu2 %v1029_v23  ;;  %v101_v35 = vsel %vm98_vm0, %v92_v29, %v93_v30  ;;  %v1078_v39 = vld [vmem:[#allocation5 + $0x30] sm:$0xf0]  ;;  %v100_v40 = vsel %vm98_vm0, %v93_v30, %v94_v32  ;;  %v1089_v41 = vor.u32 %v1223_v34, %v1086_v37  ;;  %v1076_v43 = vld [vmem:[#allocation5 + $0x20] sm:$0xf]  ;;  %v1224_v44 = vld [vmem:[#allocation5 + $0x2c] sm:$0xf0] }
  0x1e   :  { %225 = vmatpush.bf16.msra.mxu3 %v1033_v27  ;;  %v1081_v42 = vor.u32 %v1222_v38, %v1078_v39  ;;  %v1068_v45 = vld [vmem:[#allocation5 + $0x8] sm:$0xf]  ;;  %v103_v46 = vpack.c.bf16 %v100_v40, %v101_v35  ;;  %v1077_v47 = vor.u32 %v1224_v44, %v1076_v43  ;;  %v1221_v48 = vld [vmem:[#allocation5 + $0x14] sm:$0xf0]  ;;  %v1219_v49 = vld [vmem:[#allocation5 + $0xc] sm:$0xf]  ;;  %v82_v27 = vpack.c.bf16 %v1445_v26, %v1443_v25 }
  0x1f   :  { %v1070_v50 = vld [vmem:[#allocation5 + $0x18] sm:$0xf0]  ;;  %v1069_v51 = vor.u32 %v1221_v48, %v1068_v45  ;;  %v1218_v53 = vld [vmem:[#allocation5 + $0x4] sm:$0xf]  ;;  %v1062_v54 = vld [vmem:[#allocation5 + $0x10] sm:$0xf0] }
  0x20   :  { %308 = vmatpush.bf16.msrb.mxu1 %v1081_v42  ;;  %v1073_v52 = vor.u32 %v1219_v49, %v1070_v50  ;;  %v1060_v55 = vld [vmem:[#allocation5] sm:$0xf]  ;;  %1050 = vmatmul.msk.bf16.vlgmr.msra.gmra.mxu0 %vm154_vm1, %v103_v46  ;;  %v1065_v57 = vor.u32 %v1218_v53, %v1062_v54  ;;  %v1220_v58 = vld [vmem:[#allocation5 + $0xc] sm:$0xf0]  ;;  %v1124_v59 = vld [vmem:[#allocation5 + $0xa8] sm:$0xf] }
  0x21   :  { %327 = vmatpush.bf16.msrb.mxu2 %v1085_v36  ;;  %1052 = vmatmul.msk.bf16.vlgmr.msra.gmra.mxu1 %vm154_vm1, %v103_v46  ;;  %v1241_v60 = vld [vmem:[#allocation5 + $0xb4] sm:$0xf0]  ;;  %v1239_v61 = vld [vmem:[#allocation5 + $0xac] sm:$0xf]  ;;  %v1061_v62 = vor.u32 %v1220_v58, %v1060_v55  ;;  %v1126_v0 = vld [vmem:[#allocation5 + $0xb8] sm:$0xf0] }
  0x22   :  { %346 = vmatpush.bf16.msrb.mxu3 %v1089_v41  ;;  %1054 = vmatmul.msk.bf16.vlgmr.msra.gmra.mxu2 %vm154_vm1, %v103_v46  ;;  %v1125_v63 = vor.u32 %v1241_v60, %v1124_v59  ;;  %v1238_v2 = vld [vmem:[#allocation5 + $0xa4] sm:$0xf]  ;;  %v1118_v3 = vld [vmem:[#allocation5 + $0xb0] sm:$0xf0]  ;;  %v1129_v4 = vor.u32 %v1239_v61, %v1126_v0  ;;  %v1116_v6 = vld [vmem:[#allocation5 + $0xa0] sm:$0xf]  ;;  %v83_v41 = vpack.c.bf16 %v1461_v56, %v1448_v28 }
  0x23   :  { %1056 = vmatmul.msk.bf16.vlgmr.msra.gmra.mxu3 %vm154_vm1, %v103_v46  ;;  %289 = vmatpush.bf16.msrb.mxu0 %v1077_v47  ;;  %v1121_v5 = vor.u32 %v1238_v2, %v1118_v3  ;;  %v1240_v7 = vld [vmem:[#allocation5 + $0xac] sm:$0xf0]  ;;  %v95_v9 = vrot.slane %v1461_v56, 1  ;;  %v1108_v13 = vld [vmem:[#allocation5 + $0x88] sm:$0xf]  ;;  %v359_v54 = vrot.slane %v1443_v25, 2 }
  0x24   :  { %309 = vmatpush.bf16.msrb.mxu1 %v1065_v57  ;;  %v1117_v8 = vor.u32 %v1240_v7, %v1116_v6  ;;  %v1237_v14 = vld [vmem:[#allocation5 + $0x94] sm:$0xf0]  ;;  %v1235_v15 = vld [vmem:[#allocation5 + $0x8c] sm:$0xf]  ;;  %v1110_v17 = vld [vmem:[#allocation5 + $0x98] sm:$0xf0] }
  0x25   :  { %328 = vmatpush.bf16.msrb.mxu2 %v1069_v51  ;;  %v99_v10 = vsel %vm98_vm0, %v94_v32, %v95_v9  ;;  %v102_v11 = vsel %vm98_vm0, %v95_v9, %v92_v29  ;;  %v1109_v16 = vor.u32 %v1237_v14, %v1108_v13  ;;  %v1234_v18 = vld [vmem:[#allocation5 + $0x84] sm:$0xf]  ;;  %v1102_v19 = vld [vmem:[#allocation5 + $0x90] sm:$0xf0]  ;;  %v1113_v20 = vor.u32 %v1235_v15, %v1110_v17  ;;  %v1100_v22 = vld [vmem:[#allocation5 + $0x80] sm:$0xf] }
  0x26   :  { %347 = vmatpush.bf16.msrb.mxu3 %v1073_v52  ;;  %v104_v12 = vpack.c.bf16 %v102_v11, %v99_v10  ;;  %v1105_v21 = vor.u32 %v1234_v18, %v1102_v19  ;;  %v1236_v23 = vld [vmem:[#allocation5 + $0x8c] sm:$0xf0]  ;;  %v1164_v29 = vld [vmem:[#allocation5 + $0xe8] sm:$0xf]  ;;  %v1249_v30 = vld [vmem:[#allocation5 + $0xf4] sm:$0xf0] }
  0x27   :  { %290 = vmatpush.bf16.msrb.mxu0 %v1061_v62  ;;  %v1101_v24 = vor.u32 %v1236_v23, %v1100_v22  ;;  %v1247_v31 = vld [vmem:[#allocation5 + $0xec] sm:$0xf]  ;;  %v1165_v32 = vor.u32 %v1249_v30, %v1164_v29  ;;  %v1166_v33 = vld [vmem:[#allocation5 + $0xf8] sm:$0xf0]  ;;  %v1246_v34 = vld [vmem:[#allocation5 + $0xe4] sm:$0xf] }
  0x28   :  { %450 = vmatpush.bf16.msra.mxu1 %v1121_v5  ;;  %v1158_v35 = vld [vmem:[#allocation5 + $0xf0] sm:$0xf0]  ;;  %v1169_v36 = vor.u32 %v1247_v31, %v1166_v33  ;;  %v1156_v38 = vld [vmem:[#allocation5 + $0xe0] sm:$0xf]  ;;  %v1248_v39 = vld [vmem:[#allocation5 + $0xec] sm:$0xf0] }
  0x29   :  { %469 = vmatpush.bf16.msra.mxu2 %v1125_v63  ;;  %v1161_v37 = vor.u32 %v1246_v34, %v1158_v35  ;;  %v1157_v40 = vor.u32 %v1248_v39, %v1156_v38  ;;  %v1148_v42 = vld [vmem:[#allocation5 + $0xc8] sm:$0xf]  ;;  %v1245_v43 = vld [vmem:[#allocation5 + $0xd4] sm:$0xf0]  ;;  %v1243_v44 = vld [vmem:[#allocation5 + $0xcc] sm:$0xf] }
  0x2a   :  { %488 = vmatpush.bf16.msra.mxu3 %v1129_v4  ;;  %v1149_v45 = vor.u32 %v1245_v43, %v1148_v42  ;;  %v1150_v46 = vld [vmem:[#allocation5 + $0xd8] sm:$0xf0]  ;;  %v1242_v47 = vld [vmem:[#allocation5 + $0xc4] sm:$0xf]  ;;  %v1142_v48 = vld [vmem:[#allocation5 + $0xd0] sm:$0xf0] }
  0x2b   :  { %431 = vmatpush.bf16.msra.mxu0 %v1117_v8  ;;  %v1153_v49 = vor.u32 %v1243_v44, %v1150_v46  ;;  %v1145_v50 = vor.u32 %v1242_v47, %v1142_v48  ;;  %v1140_v51 = vld [vmem:[#allocation5 + $0xc0] sm:$0xf]  ;;  %v1244_v52 = vld [vmem:[#allocation5 + $0xcc] sm:$0xf0]  ;;  %v360_v55 = vrot.slane %v1445_v26, 2  ;;  %v361_v57 = vrot.slane %v1448_v28, 2 }
  0x2c   :  { %451 = vmatpush.bf16.msra.mxu1 %v1105_v21  ;;  %v1141_v53 = vor.u32 %v1244_v52, %v1140_v51  ;;  %vm363_vm2 = vcmp.lt.s32.totalorder %v1441_v1, 6  ;;  %v1204_v61 = vld [vmem:[#allocation5 + $0x128] sm:$0xf]  ;;  %v1257_v62 = vld [vmem:[#allocation5 + $0x134] sm:$0xf0]  ;;  %v362_v10 = vrot.slane %v1461_v56, 2 }
  0x2d   :  { %470 = vmatpush.bf16.msra.mxu2 %v1109_v16  ;;  %v365_v58 = vsel %vm363_vm2, %v360_v55, %v361_v57  ;;  %v366_v59 = vsel %vm363_vm2, %v359_v54, %v360_v55  ;;  %v1255_v63 = vld [vmem:[#allocation5 + $0x12c] sm:$0xf]  ;;  %v1205_v0 = vor.u32 %v1257_v62, %v1204_v61  ;;  %v1206_v2 = vld [vmem:[#allocation5 + $0x138] sm:$0xf0]  ;;  %v1254_v3 = vld [vmem:[#allocation5 + $0x124] sm:$0xf] }
  0x2e   :  { %489 = vmatpush.bf16.msra.mxu3 %v1113_v20  ;;  %v368_v60 = vpack.c.bf16 %v365_v58, %v366_v59  ;;  %v1198_v4 = vld [vmem:[#allocation5 + $0x130] sm:$0xf0]  ;;  %v1209_v5 = vor.u32 %v1255_v63, %v1206_v2  ;;  %v1196_v7 = vld [vmem:[#allocation5 + $0x120] sm:$0xf]  ;;  %v1256_v8 = vld [vmem:[#allocation5 + $0x12c] sm:$0xf0]  ;;  %v364_v11 = vsel %vm363_vm2, %v361_v57, %v362_v10 }
  0x2f   :  { %432 = vmatpush.bf16.msra.mxu0 %v1101_v24  ;;  %v1201_v6 = vor.u32 %v1254_v3, %v1198_v4  ;;  %v1197_v9 = vor.u32 %v1256_v8, %v1196_v7  ;;  %v1188_v14 = vld [vmem:[#allocation5 + $0x108] sm:$0xf]  ;;  %v1253_v15 = vld [vmem:[#allocation5 + $0x114] sm:$0xf0]  ;;  %v1251_v16 = vld [vmem:[#allocation5 + $0x10c] sm:$0xf] }
  0x30   :  { %1051 = vmatmul.msk.bf16.gmra.mxu0 %vm154_vm1, %v104_v12  ;;  %v1189_v17 = vor.u32 %v1253_v15, %v1188_v14  ;;  %v1190_v18 = vld [vmem:[#allocation5 + $0x118] sm:$0xf0]  ;;  %v1250_v19 = vld [vmem:[#allocation5 + $0x104] sm:$0xf]  ;;  %v1182_v20 = vld [vmem:[#allocation5 + $0x110] sm:$0xf0] }
  0x31   :  { %1053 = vmatmul.msk.bf16.gmra.mxu1 %vm154_vm1, %v104_v12  ;;  %v1193_v21 = vor.u32 %v1251_v16, %v1190_v18  ;;  %v1185_v22 = vor.u32 %v1250_v19, %v1182_v20  ;;  %v1180_v23 = vld [vmem:[#allocation5 + $0x100] sm:$0xf]  ;;  %v1252_v24 = vld [vmem:[#allocation5 + $0x10c] sm:$0xf0]  ;;  %v517_v29 = vrot.slane %v1443_v25, 3  ;;  %v518_v30 = vrot.slane %v1445_v26, 3 }
  0x32   :  { %1055 = vmatmul.msk.bf16.gmra.mxu2 %vm154_vm1, %v104_v12  ;;  %v519_v31 = vrot.slane %v1448_v28, 3  ;;  %vm521_vm3 = vcmp.lt.s32.totalorder %v1441_v1, 5  ;;  %v520_v35 = vrot.slane %v1461_v56, 3  ;;  %v675_v39 = vrot.slane %v1443_v25, 4  ;;  %s1403_s2 = smov [#allocation10]   ;;  %s1006_s13 = sshll.u32 %s1697_s4, 4  ;;  %s1007_s13 = int_to_ptr.hbm [resolvable:$true] %s1006_s13 }
  0x33   :  { %1057 = vmatmul.msk.bf16.gmra.mxu3 %vm154_vm1, %v104_v12  ;;  %v367_v12 = vsel %vm363_vm2, %v362_v10, %v359_v54  ;;  %v524_v33 = vsel %vm521_vm3, %v517_v29, %v518_v30  ;;  %vm679_vm4 = vcmp.lt.s32.totalorder %v1441_v1, 4  ;;  %v678_v48 = vrot.slane %v1461_v56, 4  ;;  %s1004_s3 = sshll.u32 %s1403_s2, 4  ;;  %s1005_s3 = int_to_ptr.vmem [resolvable:$true] %s1004_s3 }
  0x34   :  { %v369_v13 = vpack.c.bf16 %v367_v12, %v364_v11  ;;  %vm975_vm13 = vcmask 1041408   ;;  %vm977_vm14 = vcmask 1045508   ;;  %vm979_vm15 = vcmask 1043456  }
  0x35   :  { %vm989_vm0 = vcmask 1041409   ;;  %vm993_vm2 = vcmask 1045509  }
  0x40   :  { %1090 = vmatmul.msk.bf16.vlgmr.msrb.gmra.mxu0 %vm154_vm1, %v82_v27 }
  0x41   :  { %1092 = vmatmul.msk.bf16.vlgmr.msrb.gmra.mxu1 %vm154_vm1, %v82_v27  ;;  %589 = vmatpush.bf16.msrb.mxu0 %v1157_v40  ;;  %v676_v40 = vrot.slane %v1445_v26, 4 }
  0x42   :  { %1094 = vmatmul.msk.bf16.vlgmr.msrb.gmra.mxu2 %vm154_vm1, %v82_v27  ;;  %608 = vmatpush.bf16.msrb.mxu1 %v1161_v37  ;;  %v525_v37 = vsel %vm521_vm3, %v520_v35, %v517_v29 }
  0x43   :  { %1096 = vmatmul.msk.bf16.vlgmr.msrb.gmra.mxu3 %vm154_vm1, %v82_v27  ;;  %627 = vmatpush.bf16.msrb.mxu2 %v1165_v32  ;;  %v1181_v27 = vor.u32 %v1252_v24, %v1180_v23  ;;  %v523_v32 = vsel %vm521_vm3, %v518_v30, %v519_v31  ;;  %v682_v43 = vsel %vm679_vm4, %v675_v39, %v676_v40 }
  0x44   :  { %646 = vmatpush.bf16.msrb.mxu3 %v1169_v36  ;;  %v526_v34 = vpack.c.bf16 %v523_v32, %v524_v33  ;;  %v522_v36 = vsel %vm521_vm3, %v519_v31, %v520_v35  ;;  %vm995_vm3 = vcmask 1047559  }
  0x45   :  { %590 = vmatpush.bf16.msrb.mxu0 %v1141_v53  ;;  %v527_v38 = vpack.c.bf16 %v525_v37, %v522_v36 }
  0x46   :  { %609 = vmatpush.bf16.msrb.mxu1 %v1145_v50  ;;  %v683_v50 = vsel %vm679_vm4, %v678_v48, %v675_v39 }
  0x47   :  { %628 = vmatpush.bf16.msrb.mxu2 %v1149_v45 }
  0x48   :  { %647 = vmatpush.bf16.msrb.mxu3 %v1153_v49 }
  0x50   :  { %1091 = vmatmul.msk.bf16.gmra.mxu0 %vm154_vm1, %v83_v41 }
  0x51   :  { %1093 = vmatmul.msk.bf16.gmra.mxu1 %vm154_vm1, %v83_v41 }
  0x52   :  { %1095 = vmatmul.msk.bf16.gmra.mxu2 %vm154_vm1, %v83_v41 }
  0x53   :  { %1097 = vmatmul.msk.bf16.gmra.mxu3 %vm154_vm1, %v83_v41  ;;  %v677_v41 = vrot.slane %v1448_v28, 4 }
  0x55   :  { %v681_v42 = vsel %vm679_vm4, %v676_v40, %v677_v41  ;;  %v680_v49 = vsel %vm679_vm4, %v677_v41, %v678_v48 }
  0x56   :  { %v684_v44 = vpack.c.bf16 %v681_v42, %v682_v43  ;;  %v685_v53 = vpack.c.bf16 %v683_v50, %v680_v49 }
  0x60   :  { %1130 = vmatmul.msk.bf16.vlgmr.msra.gmra.mxu0 %vm154_vm1, %v368_v60 }
  0x61   :  { %1132 = vmatmul.msk.bf16.vlgmr.msra.gmra.mxu1 %vm154_vm1, %v368_v60  ;;  %747 = vmatpush.bf16.msra.mxu0 %v1197_v9 }
  0x62   :  { %1134 = vmatmul.msk.bf16.vlgmr.msra.gmra.mxu2 %vm154_vm1, %v368_v60  ;;  %766 = vmatpush.bf16.msra.mxu1 %v1201_v6 }
  0x63   :  { %1136 = vmatmul.msk.bf16.vlgmr.msra.gmra.mxu3 %vm154_vm1, %v368_v60  ;;  %785 = vmatpush.bf16.msra.mxu2 %v1205_v0 }
  0x64   :  { %804 = vmatpush.bf16.msra.mxu3 %v1209_v5 }
  0x65   :  { %748 = vmatpush.bf16.msra.mxu0 %v1181_v27 }
  0x66   :  { %767 = vmatpush.bf16.msra.mxu1 %v1185_v22 }
  0x67   :  { %786 = vmatpush.bf16.msra.mxu2 %v1189_v17 }
  0x68   :  { %805 = vmatpush.bf16.msra.mxu3 %v1193_v21 }
  0x70   :  { %1131 = vmatmul.msk.bf16.gmra.mxu0 %vm154_vm1, %v369_v13 }
  0x71   :  { %1133 = vmatmul.msk.bf16.gmra.mxu1 %vm154_vm1, %v369_v13 }
  0x72   :  { %1135 = vmatmul.msk.bf16.gmra.mxu2 %vm154_vm1, %v369_v13 }
  0x73   :  { %1137 = vmatmul.msk.bf16.gmra.mxu3 %vm154_vm1, %v369_v13 }
  0x80   :  { %1170 = vmatmul.msk.bf16.vlgmr.msrb.gmra.mxu0 %vm154_vm1, %v526_v34 }
  0x81   :  { %1172 = vmatmul.msk.bf16.vlgmr.msrb.gmra.mxu1 %vm154_vm1, %v526_v34 }
  0x82   :  { %1174 = vmatmul.msk.bf16.vlgmr.msrb.gmra.mxu2 %vm154_vm1, %v526_v34 }
  0x83   :  { %1176 = vmatmul.msk.bf16.vlgmr.msrb.gmra.mxu3 %vm154_vm1, %v526_v34 }
  0x90   :  { %1171 = vmatmul.msk.bf16.gmra.mxu0 %vm154_vm1, %v527_v38 }
  0x91   :  { %1173 = vmatmul.msk.bf16.gmra.mxu1 %vm154_vm1, %v527_v38 }
  0x92   :  { %1175 = vmatmul.msk.bf16.gmra.mxu2 %vm154_vm1, %v527_v38 }
  0x93   :  { %1177 = vmatmul.msk.bf16.gmra.mxu3 %vm154_vm1, %v527_v38 }
  0x9d   :  { %v170_v45 = vpop.f32.mrf.mxu0 }
  0x9e   :  { %v189_v46 = vpop.f32.mrf.mxu1 }
  0xa0   :  { %1210 = vmatmul.msk.bf16.vlgmr.msra.gmra.mxu0 %vm154_vm1, %v684_v44 }
  0xa1   :  { %1212 = vmatmul.msk.bf16.vlgmr.msra.gmra.mxu1 %vm154_vm1, %v684_v44 }
  0xa2   :  { %1214 = vmatmul.msk.bf16.vlgmr.msra.gmra.mxu2 %vm154_vm1, %v684_v44 }
  0xa3   :  { %1216 = vmatmul.msk.bf16.vlgmr.msra.gmra.mxu3 %vm154_vm1, %v684_v44 }
  0xa5   :  { %v208_v25 = vpop.f32.mrf.mxu2  ;;  %v172_v28 = vpop.f32.mrf.mxu0 }
  0xa6   :  { %v227_v26 = vpop.f32.mrf.mxu3  ;;  %v191_v47 = vpop.f32.mrf.mxu1 }
  0xad   :  { %v210_v51 = vpop.f32.mrf.mxu2  ;;  %v175_v54 = vpop.f32.mrf.mxu0 }
  0xae   :  { %v229_v52 = vpop.f32.mrf.mxu3  ;;  %v194_v55 = vpop.f32.mrf.mxu1 }
  0xb0   :  { %1211 = vmatmul.msk.bf16.gmra.mxu0 %vm154_vm1, %v685_v53 }
  0xb1   :  { %1213 = vmatmul.msk.bf16.gmra.mxu1 %vm154_vm1, %v685_v53 }
  0xb2   :  { %1215 = vmatmul.msk.bf16.gmra.mxu2 %vm154_vm1, %v685_v53 }
  0xb3   :  { %1217 = vmatmul.msk.bf16.gmra.mxu3 %vm154_vm1, %v685_v53  ;;  %vm991_vm1 = vcmask 1043459  }
  0xb5   :  { %v213_v56 = vpop.f32.mrf.mxu2  ;;  %v177_v58 = vpop.f32.mrf.mxu0 }
  0xb6   :  { %v232_v57 = vpop.f32.mrf.mxu3  ;;  %v196_v59 = vpop.f32.mrf.mxu1 }
  0xbd   :  { %v215_v60 = vpop.f32.mrf.mxu2  ;;  %v292_v62 = vpop.f32.mrf.mxu0 }
  0xbe   :  { %v234_v61 = vpop.f32.mrf.mxu3  ;;  %v311_v63 = vpop.f32.mrf.mxu1  ;;  %v293_v0 = vadd.f32 %v292_v62, %v170_v45 }
  0xbf   :  { %v312_v2 = vadd.f32 %v311_v63, %v189_v46 }
  0xc5   :  { %v330_v3 = vpop.f32.mrf.mxu2  ;;  %v294_v7 = vpop.f32.mrf.mxu0 }
  0xc6   :  { %v349_v4 = vpop.f32.mrf.mxu3  ;;  %v331_v5 = vadd.f32 %v330_v3, %v208_v25  ;;  %v313_v8 = vpop.f32.mrf.mxu1  ;;  %v295_v9 = vadd.f32 %v294_v7, %v172_v28 }
  0xc7   :  { %v350_v6 = vadd.f32 %v349_v4, %v227_v26  ;;  %v314_v10 = vadd.f32 %v313_v8, %v191_v47 }
  0xcd   :  { %v332_v11 = vpop.f32.mrf.mxu2  ;;  %v297_v15 = vpop.f32.mrf.mxu0 }
  0xce   :  { %v351_v12 = vpop.f32.mrf.mxu3  ;;  %v333_v13 = vadd.f32 %v332_v11, %v210_v51  ;;  %v316_v16 = vpop.f32.mrf.mxu1  ;;  %v298_v17 = vadd.f32 %v297_v15, %v175_v54 }
  0xcf   :  { %v352_v14 = vadd.f32 %v351_v12, %v229_v52  ;;  %v317_v18 = vadd.f32 %v316_v16, %v194_v55 }
  0xd5   :  { %v335_v19 = vpop.f32.mrf.mxu2  ;;  %v299_v23 = vpop.f32.mrf.mxu0 }
  0xd6   :  { %v354_v20 = vpop.f32.mrf.mxu3  ;;  %v336_v21 = vadd.f32 %v335_v19, %v213_v56  ;;  %v318_v24 = vpop.f32.mrf.mxu1  ;;  %v300_v27 = vadd.f32 %v299_v23, %v177_v58 }
  0xd7   :  { %v355_v22 = vadd.f32 %v354_v20, %v232_v57  ;;  %v319_v29 = vadd.f32 %v318_v24, %v196_v59 }
  0xdd   :  { %v337_v30 = vpop.f32.mrf.mxu2  ;;  %v434_v34 = vpop.f32.mrf.mxu0 }
  0xde   :  { %v356_v31 = vpop.f32.mrf.mxu3  ;;  %v338_v32 = vadd.f32 %v337_v30, %v215_v60  ;;  %v453_v35 = vpop.f32.mrf.mxu1  ;;  %v501_v36 = vadd.f32 %v434_v34, %v293_v0 }
  0xdf   :  { %v1543_v33 = vadd.f32 %v356_v31, %v234_v61  ;;  %v502_v37 = vadd.f32 %v453_v35, %v312_v2 }
  0xe5   :  { %v472_v38 = vpop.f32.mrf.mxu2  ;;  %v436_v42 = vpop.f32.mrf.mxu0 }
  0xe6   :  { %v491_v39 = vpop.f32.mrf.mxu3  ;;  %v503_v40 = vadd.f32 %v472_v38, %v331_v5  ;;  %v455_v43 = vpop.f32.mrf.mxu1  ;;  %v505_v44 = vadd.f32 %v436_v42, %v295_v9 }
  0xe7   :  { %v504_v41 = vadd.f32 %v491_v39, %v350_v6  ;;  %v506_v45 = vadd.f32 %v455_v43, %v314_v10 }
  0xed   :  { %v474_v46 = vpop.f32.mrf.mxu2  ;;  %v439_v47 = vpop.f32.mrf.mxu0 }
  0xee   :  { %v493_v25 = vpop.f32.mrf.mxu3  ;;  %v1545_v26 = vadd.f32 %v474_v46, %v333_v13  ;;  %v458_v48 = vpop.f32.mrf.mxu1  ;;  %v1549_v49 = vadd.f32 %v439_v47, %v298_v17  ;;  %v833_v13 = vld [vmem:[#allocation7] sm:$0xf]  ;;  %v876_v17 = vld [vmem:[#allocation8] sm:$0xf] }
  0xef   :  { %v1547_v28 = vadd.f32 %v493_v25, %v352_v14  ;;  %v1551_v50 = vadd.f32 %v458_v48, %v317_v18  ;;  %v1567_v19 = vperm.slane %v833_v13, 0  ;;  %v877_v23 = vperm.slane %v876_v17, 0 }
  0xf0   :  { %v878_v34 = vperm.slane %v876_v17, 1  ;;  %v879_v38 = vperm.slane %v876_v17, 2 }
  0xf1   :  { %vm1584_vm5 = vcmp.le.s32.totalorder %v1441_v1, %v877_v23 }
  0xf2   :  { %vm1593_vm6 = vcmp.le.s32.totalorder %v1441_v1, %v878_v34  ;;  %vm1598_vm7 = vcmp.le.s32.totalorder %v1441_v1, %v879_v38 }
  0xf5   :  { %v477_v51 = vpop.f32.mrf.mxu2  ;;  %v441_v55 = vpop.f32.mrf.mxu0 }
  0xf6   :  { %v496_v52 = vpop.f32.mrf.mxu3  ;;  %v1553_v53 = vadd.f32 %v477_v51, %v336_v21  ;;  %v460_v56 = vpop.f32.mrf.mxu1  ;;  %v1569_v21 = vperm.slane %v833_v13, 1 }
  0xf7   :  { %v1555_v54 = vadd.f32 %v496_v52, %v355_v22  ;;  %v1571_v22 = vadd.f32 %v441_v55, %v300_v27  ;;  %v1573_v24 = vadd.f32 %v460_v56, %v319_v29 }
  0xfd   :  { %v479_v57 = vpop.f32.mrf.mxu2  ;;  %v592_v59 = vpop.f32.mrf.mxu0 }
  0xfe   :  { %v498_v58 = vpop.f32.mrf.mxu3  ;;  %v611_v60 = vpop.f32.mrf.mxu1  ;;  %v659_v15 = vadd.f32 %v592_v59, %v501_v36  ;;  %v1575_v30 = vadd.f32 %v479_v57, %v338_v32  ;;  %v880_v36 = vperm.slane %v876_v17, 3 }
  0xff   :  { %v660_v16 = vadd.f32 %v611_v60, %v502_v37  ;;  %v875_v37 = vadd.s32 8, %v1441_v1  ;;  %v1581_v29 = vadd.f32 %v498_v58, %v1543_v33 }
 0x100   :  { %vm1603_vm8 = vcmp.le.s32.totalorder %v1441_v1, %v880_v36 }
 0x101   :  { %vm1607_vm9 = vcmp.le.s32.totalorder %v875_v37, %v877_v23  ;;  %vm1616_vm10 = vcmp.le.s32.totalorder %v875_v37, %v878_v34  ;;  %vm1624_vm11 = vcmp.le.s32.totalorder %v875_v37, %v879_v38  ;;  %vm1628_vm12 = vcmp.le.s32.totalorder %v875_v37, %v880_v36 }
 0x105   :  { %v630_v61 = vpop.f32.mrf.mxu2  ;;  %v594_v63 = vpop.f32.mrf.mxu0 }
 0x106   :  { %v649_v62 = vpop.f32.mrf.mxu3  ;;  %v613_v0 = vpop.f32.mrf.mxu1  ;;  %v661_v31 = vadd.f32 %v630_v61, %v503_v40  ;;  %v663_v39 = vadd.f32 %v594_v63, %v505_v44  ;;  %v1588_v40 = vperm.slane %v833_v13, 2 }
 0x107   :  { %v662_v35 = vadd.f32 %v649_v62, %v504_v41  ;;  %v664_v42 = vadd.f32 %v613_v0, %v506_v45  ;;  %v1590_v41 = vperm.slane %v833_v13, 3 }
 0x10d   :  { %v632_v2 = vpop.f32.mrf.mxu2  ;;  %v597_v4 = vpop.f32.mrf.mxu0 }
 0x10e   :  { %v651_v3 = vpop.f32.mrf.mxu3  ;;  %v616_v5 = vpop.f32.mrf.mxu1  ;;  %v665_v62 = vadd.f32 %v632_v2, %v1545_v26  ;;  %v667_v0 = vadd.f32 %v597_v4, %v1549_v49 }
 0x10f   :  { %v666_v63 = vadd.f32 %v651_v3, %v1547_v28 }
 0x115   :  { %v635_v6 = vpop.f32.mrf.mxu2  ;;  %v1559_v8 = vpop.f32.mrf.mxu0 }
 0x116   :  { %v1557_v7 = vpop.f32.mrf.mxu3  ;;  %v1561_v9 = vpop.f32.mrf.mxu1  ;;  %v669_v17 = vadd.f32 %v635_v6, %v1553_v53 }
 0x11d   :  { %v1563_v10 = vpop.f32.mrf.mxu2  ;;  %v750_v12 = vpop.f32.mrf.mxu0 }
 0x11e   :  { %v1565_v11 = vpop.f32.mrf.mxu3  ;;  %v769_v14 = vpop.f32.mrf.mxu1  ;;  %v817_v18 = vadd.f32 %v750_v12, %v659_v15 }
 0x11f   :  { %v818_v20 = vadd.f32 %v769_v14, %v660_v16  ;;  %v668_v16 = vadd.f32 %v616_v5, %v1551_v50 }
 0x120   :  { %v843_v43 = vadd.f32 %v1567_v19, %v817_v18 }
 0x121   :  { %v844_v46 = vadd.f32 %v1569_v21, %v818_v20 }
 0x122   :  { %v859_v58 = vmax.f32 %v843_v43, 0.0 }
 0x123   :  { %v860_v59 = vmax.f32 %v844_v46, 0.0  ;;  %v670_v46 = vadd.f32 %v1557_v7, %v1555_v54 }
 0x124   :  { %v889_v49 = vsel %vm1584_vm5, %v859_v58, 0.0 }
 0x125   :  { %v788_v27 = vpop.f32.mrf.mxu2  ;;  %v752_v44 = vpop.f32.mrf.mxu0  ;;  %v890_v2 = vsel %vm1593_vm6, %v860_v59, 0.0  ;;  %v674_v59 = vadd.f32 %v1565_v11, %v1581_v29 }
 0x126   :  { %v807_v25 = vpop.f32.mrf.mxu3  ;;  %v771_v45 = vpop.f32.mrf.mxu1  ;;  %v819_v47 = vadd.f32 %v788_v27, %v661_v31  ;;  %v821_v51 = vadd.f32 %v752_v44, %v663_v39  ;;  %v671_v27 = vadd.f32 %v1559_v8, %v1571_v22 }
 0x127   :  { %v820_v48 = vadd.f32 %v807_v25, %v662_v35  ;;  %v822_v52 = vadd.f32 %v771_v45, %v664_v42  ;;  %v672_v25 = vadd.f32 %v1561_v9, %v1573_v24 }
 0x128   :  { %v847_v60 = vadd.f32 %v1567_v19, %v821_v51  ;;  %v845_v12 = vadd.f32 %v1588_v40, %v819_v47 }
 0x129   :  { %v848_v61 = vadd.f32 %v1569_v21, %v822_v52  ;;  %v846_v13 = vadd.f32 %v1590_v41, %v820_v48  ;;  %v673_v52 = vadd.f32 %v1563_v10, %v1575_v30 }
 0x12a   :  { %v863_v14 = vmax.f32 %v847_v60, 0.0  ;;  %v861_v34 = vmax.f32 %v845_v12, 0.0 }
 0x12b   :  { %v864_v15 = vmax.f32 %v848_v61, 0.0  ;;  %v862_v35 = vmax.f32 %v846_v13, 0.0 }
 0x12c   :  { %v893_v3 = vsel %vm1607_vm9, %v863_v14, 0.0  ;;  %v891_v58 = vsel %vm1598_vm7, %v861_v34, 0.0 }
 0x12d   :  { %v894_v50 = vsel %vm1616_vm10, %v864_v15, 0.0  ;;  %v790_v53 = vpop.f32.mrf.mxu2  ;;  %v905_v5 = vmax.f32 %v889_v49, %v893_v3  ;;  %v755_v23 = vpop.f32.mrf.mxu0  ;;  %v892_v54 = vsel %vm1603_vm8, %v862_v35, 0.0 }
 0x12e   :  { %v809_v4 = vpop.f32.mrf.mxu3  ;;  %v912_v6 = vmax.f32 %v890_v2, %v894_v50  ;;  %v823_v18 = vadd.f32 %v790_v53, %v665_v62  ;;  %v774_v31 = vpop.f32.mrf.mxu1  ;;  %v825_v38 = vadd.f32 %v755_v23, %v667_v0 }
 0x12f   :  { %v824_v20 = vadd.f32 %v809_v4, %v666_v63  ;;  %v826_v36 = vadd.f32 %v774_v31, %v668_v16  ;;  %v906_v37 = vrot.slane %v905_v5, 4 }
 0x130   :  { %v913_v39 = vrot.slane %v912_v6, 4  ;;  %v849_v42 = vadd.f32 %v1588_v40, %v823_v18  ;;  %v851_v44 = vadd.f32 %v1567_v19, %v825_v38 }
 0x131   :  { %v850_v43 = vadd.f32 %v1590_v41, %v824_v20  ;;  %v907_v45 = vmax.f32 %v905_v5, %v906_v37  ;;  %v852_v7 = vadd.f32 %v1569_v21, %v826_v36 }
 0x132   :  { %v914_v47 = vmax.f32 %v912_v6, %v913_v39  ;;  %v865_v48 = vmax.f32 %v849_v42, 0.0  ;;  %v867_v60 = vmax.f32 %v851_v44, 0.0 }
 0x133   :  { %v866_v51 = vmax.f32 %v850_v43, 0.0  ;;  %v908_v8 = vrot.slane %v907_v45, 2  ;;  %v868_v4 = vmax.f32 %v852_v7, 0.0 }
 0x134   :  { %v915_v22 = vrot.slane %v914_v47, 2  ;;  %v895_v9 = vsel %vm1624_vm11, %v865_v48, 0.0 }
 0x135   :  { %v896_v24 = vsel %vm1628_vm12, %v866_v51, 0.0  ;;  %v919_v10 = vmax.f32 %v891_v58, %v895_v9  ;;  %v793_v61 = vpop.f32.mrf.mxu2  ;;  %v909_v63 = vmax.f32 %v907_v45, %v908_v8  ;;  %v757_v14 = vpop.f32.mrf.mxu0  ;;  %v898_v39 = vsel %vm1593_vm6, %v868_v4, 0.0 }
 0x136   :  { %v926_v30 = vmax.f32 %v892_v54, %v896_v24  ;;  %v812_v62 = vpop.f32.mrf.mxu3  ;;  %v916_v0 = vmax.f32 %v914_v47, %v915_v22  ;;  %v827_v12 = vadd.f32 %v793_v61, %v669_v17  ;;  %v776_v15 = vpop.f32.mrf.mxu1  ;;  %v829_v2 = vadd.f32 %v757_v14, %v671_v27 }
 0x137   :  { %v828_v13 = vadd.f32 %v812_v62, %v670_v46  ;;  %v920_v16 = vrot.slane %v919_v10, 4  ;;  %v830_v3 = vadd.f32 %v776_v15, %v672_v25  ;;  %v910_v50 = vrot.slane %v909_v63, 1 }
 0x138   :  { %v927_v49 = vrot.slane %v926_v30, 4  ;;  %v917_v53 = vrot.slane %v916_v0, 1  ;;  %v853_v11 = vadd.f32 %v1588_v40, %v827_v12  ;;  %v855_v6 = vadd.f32 %v1567_v19, %v829_v2 }
 0x139   :  { %v921_v29 = vmax.f32 %v919_v10, %v920_v16  ;;  %v856_v18 = vadd.f32 %v1569_v21, %v830_v3  ;;  %v897_v17 = vsel %vm1584_vm5, %v867_v60, 0.0  ;;  %v854_v23 = vadd.f32 %v1590_v41, %v828_v13 }
 0x13a   :  { %v928_v5 = vmax.f32 %v926_v30, %v927_v49  ;;  %v918_v20 = vmax.f32 %v916_v0, %v917_v53  ;;  %v871_v35 = vmax.f32 %v855_v6, 0.0  ;;  %v911_v36 = vmax.f32 %v909_v63, %v910_v50 }
 0x13b   :  { %v922_v31 = vrot.slane %v921_v29, 2  ;;  %v872_v38 = vmax.f32 %v856_v18, 0.0  ;;  %v869_v42 = vmax.f32 %v853_v11, 0.0  ;;  %v870_v58 = vmax.f32 %v854_v23, 0.0 }
 0x13c   :  { %v929_v34 = vrot.slane %v928_v5, 2  ;;  %v969_v37 = vrot.slane %v918_v20, 6  ;;  %v901_v21 = vsel %vm1607_vm9, %v871_v35, 0.0 }
 0x13d   :  { %v923_v19 = vmax.f32 %v921_v29, %v922_v31  ;;  %v902_v32 = vsel %vm1616_vm10, %v872_v38, 0.0  ;;  %v795_v46 = vpop.f32.mrf.mxu2  ;;  %v933_v25 = vmax.f32 %v897_v17, %v901_v21  ;;  %v899_v60 = vsel %vm1598_vm7, %v869_v42, 0.0 }
 0x13e   :  { %v930_v43 = vmax.f32 %v928_v5, %v929_v34  ;;  %v814_v27 = vpop.f32.mrf.mxu3  ;;  %v940_v44 = vmax.f32 %v898_v39, %v902_v32  ;;  %v831_v45 = vadd.f32 %v795_v46, %v673_v52  ;;  %v976_v55 = vsel %vm975_vm13, %v911_v36, %v969_v37 }
 0x13f   :  { %v832_v47 = vadd.f32 %v814_v27, %v674_v59  ;;  %v924_v48 = vrot.slane %v923_v19, 1  ;;  %v934_v54 = vrot.slane %v933_v25, 4  ;;  %v900_v61 = vsel %vm1603_vm8, %v870_v58, 0.0 }
 0x140   :  { %v931_v51 = vrot.slane %v930_v43, 1  ;;  %v941_v7 = vrot.slane %v940_v44, 4  ;;  %v857_v8 = vadd.f32 %v1588_v40, %v831_v45 }
 0x141   :  { %v858_v57 = vadd.f32 %v1590_v41, %v832_v47  ;;  %v925_v22 = vmax.f32 %v923_v19, %v924_v48  ;;  %v935_v9 = vmax.f32 %v933_v25, %v934_v54 }
 0x142   :  { %v932_v1 = vmax.f32 %v930_v43, %v931_v51  ;;  %v942_v24 = vmax.f32 %v940_v44, %v941_v7  ;;  %v873_v10 = vmax.f32 %v857_v8, 0.0 }
 0x143   :  { %v874_v52 = vmax.f32 %v858_v57, 0.0  ;;  %v970_v59 = vrot.slane %v925_v22, 4  ;;  %v936_v62 = vrot.slane %v935_v9, 2 }
 0x144   :  { %v971_v30 = vrot.slane %v932_v1, 2  ;;  %v943_v40 = vrot.slane %v942_v24, 2  ;;  %v903_v41 = vsel %vm1624_vm11, %v873_v10, 0.0 }
 0x145   :  { %v904_v63 = vsel %vm1628_vm12, %v874_v52, 0.0  ;;  %v947_v0 = vmax.f32 %v899_v60, %v903_v41  ;;  %v937_v14 = vmax.f32 %v935_v9, %v936_v62 }
 0x146   :  { %v954_v12 = vmax.f32 %v900_v61, %v904_v63  ;;  %v978_v13 = vsel %vm977_vm14, %v970_v59, %v971_v30  ;;  %v944_v15 = vmax.f32 %v942_v24, %v943_v40 }
 0x147   :  { %v980_v33 = vsel %vm979_vm15, %v976_v55, %v978_v13  ;;  %v948_v16 = vrot.slane %v947_v0, 4  ;;  %v938_v56 = vrot.slane %v937_v14, 1 }
 0x148   :  { %v955_v49 = vrot.slane %v954_v12, 4  ;;  %v945_v2 = vrot.slane %v944_v15, 1 }
 0x149   :  { %v949_v3 = vmax.f32 %v947_v0, %v948_v16  ;;  %v939_v11 = vmax.f32 %v937_v14, %v938_v56 }
 0x14a   :  { %v956_v50 = vmax.f32 %v954_v12, %v955_v49  ;;  %v946_v53 = vmax.f32 %v944_v15, %v945_v2 }
 0x14b   :  { %v950_v26 = vrot.slane %v949_v3, 2 }
 0x14c   :  { %v957_v4 = vrot.slane %v956_v50, 2  ;;  %v972_v28 = vrot.slane %v946_v53, 6 }
 0x14d   :  { %v951_v29 = vmax.f32 %v949_v3, %v950_v26 }
 0x14e   :  { %v958_v5 = vmax.f32 %v956_v50, %v957_v4  ;;  %v981_v6 = vsel %vm975_vm13, %v939_v11, %v972_v28 }
 0x14f   :  { %v952_v18 = vrot.slane %v951_v29, 1 }
 0x150   :  { %v959_v20 = vrot.slane %v958_v5, 1 }
 0x151   :  { %v953_v17 = vmax.f32 %v951_v29, %v952_v18 }
 0x152   :  { %v960_v23 = vmax.f32 %v958_v5, %v959_v20 }
 0x153   :  { %v973_v31 = vrot.slane %v953_v17, 4 }
 0x154   :  { %v974_v34 = vrot.slane %v960_v23, 2 }
 0x156   :  { %v982_v35 = vsel %vm977_vm14, %v973_v31, %v974_v34 }
 0x157   :  { %v983_v38 = vsel %vm979_vm15, %v981_v6, %v982_v35 }
 0x158   :  { %v988_v36 = vrot.slane %v983_v38, 7 }
 0x15a   :  { %v990_v37 = vsel %vm989_vm0, %v988_v36, %v980_v33 }
 0x15b   :  { %v992_v39 = vsel %vm991_vm1, %v988_v36, %v990_v37 }
 0x15c   :  { %v994_v42 = vsel %vm993_vm2, %v988_v36, %v992_v39 }
 0x15d   :  { %v996_v19 = vsel %vm995_vm3, %v988_v36, %v994_v42 }
 0x15e   :  { %998 = vst [vmem:[#allocation10] sm:$0xff] %v996_v19 }
 0x15f   :  { %1009 = dma.vmem_to_hbm [thread:$0]  %s1005_s3, 128, %s1007_s13, [#allocation4]  }
 0x160   :  { %1393 = dma.done.wait [#allocation4], 128  }
 0x161   :  { %1394 = vsyncadd [#allocation4], 4294967168 }
 0x162   :  { %1014 = vsyncpa [#allocation3], 1 }
 0x163   :  { %1015 = vsyncpa [#allocation6], 1 }
 0x164   :  { %1016 = vsyncpa [#allocation9], 1 }
 0x165   :  { %1017 = vsyncpa [#allocation4], 1 }

</bundles_post_ra>
